<compile_context>
chip_gen: v5e
topology: v5e:2x2
jax: 0.10.0
libtpu: 0.0.40
codegen_flags: <defaults>
</compile_context>

<pallas_src>
import functools
import math

import jax
import jax.numpy as jnp
from jax.experimental import pallas as pl
from jax.experimental.pallas import tpu as pltpu

NUM_EXPERTS = 5
DROP_RATE = 0.1


def _round_up(a, m):
  return (a + m - 1) // m * m


def _mix32(v):
  """lowbias32 integer mixer on a uint32 array."""
  v = v ^ (v >> 16)
  v = v * jnp.uint32(0x7FEB352D)
  v = v ^ (v >> 15)
  v = v * jnp.uint32(0x846CA68B)
  v = v ^ (v >> 16)
  return v


def _binomial_thresholds(num_experts, keep_prob):
  """uint32 thresholds T_c = round(P(Binomial(n, keep) <= c) * 2^32), c=0..n-1.

  With a single uniform u32 draw `u`, `sum_c [u >= T_c]` is distributed exactly
  as Binomial(num_experts, keep_prob), i.e. the keep-count of num_experts
  independent dropout draws for one element.
  """
  ts = []
  cdf = 0.0
  for c in range(num_experts):
    cdf += (math.comb(num_experts, c) * (keep_prob ** c)
            * ((1.0 - keep_prob) ** (num_experts - c)))
    t = int(round(min(cdf, 1.0) * (1 << 32)))
    ts.append(min(max(t, 0), (1 << 32) - 1))
  return tuple(ts)


def _multi_dropout_kernel(seed_ref, x_ref, w_ref, b_ref, o_ref, *scratch,
                          thresholds, coef, apply_dropout, tile_m, tile_k,
                          k_stride, n_k_blocks, use_acc, use_xs_cache,
                          mxu_dtype):
  """Grid = (M tiles, N tiles, K tiles); K (last axis) is the reduction."""
  i = pl.program_id(0)          # batch tile
  j = pl.program_id(1)          # output-feature tile
  k = pl.program_id(2)          # reduction tile

  sidx = 0
  acc_ref = None
  if use_acc:
    acc_ref = scratch[sidx]
    sidx += 1
  xs_cache = None
  if use_xs_cache:
    xs_cache = scratch[sidx]
    sidx += 1

  def compute_xs():
    xv = x_ref[...]
    if not apply_dropout:
      return xv.astype(mxu_dtype)
    x = xv.astype(jnp.float32)
    # Global element index -> uint32 counter (logical-K stride: masks are
    # independent of tiling/padding; padded columns multiply zeros so any
    # counter collisions there are harmless).
    rows = jax.lax.broadcasted_iota(jnp.int32, x.shape, 0) + i * tile_m
    cols = jax.lax.broadcasted_iota(jnp.int32, x.shape, 1) + k * tile_k
    counter = (rows.astype(jnp.uint32) * jnp.uint32(k_stride)
               + cols.astype(jnp.uint32)
               + seed_ref[0].astype(jnp.uint32))
    bits = _mix32(counter)                       # ONE hash per element
    count = jnp.zeros(x.shape, jnp.int32)        # Binomial keep-count via CDF
    for t in thresholds:                         # static unroll: int cmp + add
      count = count + (bits >= jnp.uint32(t)).astype(jnp.int32)
    scale = count.astype(jnp.float32) * jnp.float32(coef)
    return (x * scale).astype(mxu_dtype)

  if use_xs_cache:
    # The dropout mask depends only on (i, k); compute it once per batch tile
    # (at j == 0) and reuse the scaled x for every output-feature tile j > 0.
    @pl.when(j == 0)
    def _():
      xs_cache[k] = compute_xs()

    xs = xs_cache[k]
  else:
    xs = compute_xs()

  # Single MXU matmul per grid step: (tm, tk) @ (tk, tn), f32 accumulation.
  y = jnp.dot(xs, w_ref[...], preferred_element_type=jnp.float32)
  bias = b_ref[...].astype(jnp.float32)          # (1, tn)

  if n_k_blocks == 1:
    o_ref[...] = (y + bias).astype(o_ref.dtype)
  elif not use_acc:
    # f32 output: accumulate directly into the resident output block.
    @pl.when(k == 0)
    def _():
      o_ref[...] = y + bias

    @pl.when(k > 0)
    def _():
      o_ref[...] = o_ref[...] + y
  else:
    @pl.when(k == 0)
    def _():
      acc_ref[...] = y

    @pl.when(k > 0)
    def _():
      acc_ref[...] = acc_ref[...] + y

    @pl.when(k == n_k_blocks - 1)
    def _():
      o_ref[...] = (acc_ref[...] + bias).astype(o_ref.dtype)


def multi_dropout(x, weight, bias, seed, *, num_experts=NUM_EXPERTS,
                  drop_rate=DROP_RATE, tile_m=512, tile_n=1024, tile_k=1024,
                  use_bf16_mxu=True):
  """x: (B, K); weight: (N, K) (PyTorch nn.Linear layout); bias: (N,)."""
  B, K = x.shape
  N, K_w = weight.shape
  assert K_w == K
  assert 0.0 <= drop_rate < 1.0
  out_dtype = x.dtype
  mxu_dtype = jnp.bfloat16 if use_bf16_mxu else jnp.float32

  # Pad B to a multiple of 8 and K/N to multiples of 128 so tiles are dense
  # and the output store is an unmasked lane-dense vst. Padded zeros add
  # nothing to the matmul and are sliced off afterwards.
  Bp = _round_up(B, 8)
  Kp = _round_up(K, 128)
  Np = _round_up(N, 128)
  tm = min(_round_up(tile_m, 8), Bp)
  tk = min(_round_up(tile_k, 128), Kp)
  tn = min(_round_up(tile_n, 128), Np)
  Bp = _round_up(Bp, tm)
  Kp = _round_up(Kp, tk)
  Np = _round_up(Np, tn)

  # One-time wrapper prep: downcast fused with pad (skip pad when aligned),
  # weight transposed once to (K, N) so the kernel contracts on a standard
  # (tk, tn) RHS with no per-tile layout fixup.
  xq = x.astype(mxu_dtype)
  if (Bp, Kp) != (B, K):
    xq = jnp.pad(xq, ((0, Bp - B), (0, Kp - K)))
  wq = weight.T.astype(mxu_dtype)
  if (Kp, Np) != (K, N):
    wq = jnp.pad(wq, ((0, Kp - K), (0, Np - N)))
  bq = bias.astype(jnp.float32).reshape(1, N)
  if Np != N:
    bq = jnp.pad(bq, ((0, 0), (0, Np - N)))
  seed_arr = jnp.asarray([seed], dtype=jnp.int32)

  grid = (Bp // tm, Np // tn, Kp // tk)
  n_i, n_j, n_k = grid

  apply_dropout = drop_rate > 0.0
  keep_prob = 1.0 - drop_rate
  coef = 1.0 / (keep_prob * num_experts)
  thresholds = _binomial_thresholds(num_experts, keep_prob)

  # f32 outputs accumulate straight into o_ref; only low-precision outputs
  # need an f32 VMEM accumulator.
  use_acc = (n_k > 1) and (out_dtype != jnp.float32)
  # Cache the dropout-scaled x across N tiles when it fits a conservative
  # per-core VMEM budget (safe on v7x's 64 MiB as well as v5e/v6e's 128 MiB).
  xs_cache_bytes = n_k * tm * tk * jnp.dtype(mxu_dtype).itemsize
  use_xs_cache = apply_dropout and (n_j > 1) and (xs_cache_bytes <= 8 * 1024 * 1024)

  scratch_shapes = []
  if use_acc:
    scratch_shapes.append(pltpu.VMEM((tm, tn), jnp.float32))
  if use_xs_cache:
    scratch_shapes.append(pltpu.VMEM((n_k, tm, tk), mxu_dtype))

  # Explicit VMEM budget (double-buffered tiles + scratch), capped below v7x's
  # 64 MiB physical VMEM.
  ib = jnp.dtype(mxu_dtype).itemsize
  ob = jnp.dtype(out_dtype).itemsize
  vmem_needed = (2 * tm * tk * ib + 2 * tk * tn * ib + 2 * tn * 4
                 + 2 * tm * tn * ob
                 + (tm * tn * 4 if use_acc else 0)
                 + (xs_cache_bytes if use_xs_cache else 0))
  vmem_limit = max(32 * 1024 * 1024, int(vmem_needed * 1.25) + (2 << 20))
  vmem_limit = min(vmem_limit, 56 * 1024 * 1024)

  kernel = functools.partial(
      _multi_dropout_kernel,
      thresholds=thresholds, coef=float(coef), apply_dropout=apply_dropout,
      tile_m=tm, tile_k=tk, k_stride=K, n_k_blocks=n_k,
      use_acc=use_acc, use_xs_cache=use_xs_cache, mxu_dtype=mxu_dtype)

  # When the xs cache is used, j>0 steps depend on the j==0 step of the same
  # batch tile, so the j axis must be "arbitrary"; batch tiles remain
  # megacore-shardable (on v7x keep >=2 batch tiles for 2-TC utilization).
  j_sem = "arbitrary" if use_xs_cache else "parallel"

  grid_spec = pltpu.PrefetchScalarGridSpec(
      num_scalar_prefetch=1,                 # seed lands in SMEM
      grid=grid,
      in_specs=[
          pl.BlockSpec((tm, tk), lambda i, j, k, seed: (i, k)),   # x (bf16/f32)
          pl.BlockSpec((tk, tn), lambda i, j, k, seed: (k, j)),   # W^T (K, N)
          pl.BlockSpec((1, tn), lambda i, j, k, seed: (0, j)),    # bias
      ],
      out_specs=pl.BlockSpec((tm, tn), lambda i, j, k, seed: (i, j)),
      scratch_shapes=scratch_shapes,
  )

  out_padded = pl.pallas_call(
      kernel,
      out_shape=jax.ShapeDtypeStruct((Bp, Np), out_dtype),
      grid_spec=grid_spec,
      compiler_params=pltpu.CompilerParams(
          dimension_semantics=("parallel", j_sem, "arbitrary"),
          vmem_limit_bytes=vmem_limit,
      ),
  )(seed_arr, xq, wq, bq)

  return out_padded[:B, :N]


if __name__ == "__main__":
  key = jax.random.PRNGKey(0)
  kx, kw, kb, kx2, kw2, kb2 = jax.random.split(key, 6)

  # --- Small shape consistent with the module (single-tile path). ---
  batch, input_dim, output_dim = 8, 32, 16
  x = jax.random.normal(kx, (batch, input_dim), dtype=jnp.float32)
  bound = 1.0 / (input_dim ** 0.5)
  weight = jax.random.uniform(kw, (output_dim, input_dim),
                              minval=-bound, maxval=bound, dtype=jnp.float32)
  bias = jax.random.uniform(kb, (output_dim,),
                            minval=-bound, maxval=bound, dtype=jnp.float32)

  out = jax.block_until_ready(multi_dropout(x, weight, bias, seed=1234))
  assert out.shape == (batch, output_dim)
  assert bool(jnp.all(jnp.isfinite(out)))

  # drop_rate=0 -> every expert is identity-dropout, so the result must equal
  # the plain Linear forward (f32 MXU path).
  out_nodrop = jax.block_until_ready(
      multi_dropout(x, weight, bias, seed=0, drop_rate=0.0, use_bf16_mxu=False))
  ref = x @ weight.T + bias
  assert bool(jnp.allclose(out_nodrop, ref, atol=1e-5, rtol=1e-5))

  # --- Multi-tile path: exercises K accumulation, N tiling and the xs cache. ---
  B2, K2, N2 = 16, 256, 256
  x2 = jax.random.normal(kx2, (B2, K2), dtype=jnp.float32)
  w2 = jax.random.normal(kw2, (N2, K2), dtype=jnp.float32) * 0.05
  b2 = jax.random.normal(kb2, (N2,), dtype=jnp.float32) * 0.05

  out2 = jax.block_until_ready(
      multi_dropout(x2, w2, b2, seed=7, tile_m=8, tile_n=128, tile_k=128))
  assert out2.shape == (B2, N2)
  assert bool(jnp.all(jnp.isfinite(out2)))

  out2_nodrop = jax.block_until_ready(
      multi_dropout(x2, w2, b2, seed=0, drop_rate=0.0, use_bf16_mxu=False,
                    tile_m=8, tile_n=128, tile_k=128))
  ref2 = x2 @ w2.T + b2
  assert bool(jnp.allclose(out2_nodrop, ref2, atol=1e-3, rtol=1e-3))

  print("KERNEL_OK")
</pallas_src>

<mosaic_0001>
module attributes {stable_mosaic.version = 11 : i64} {
  func.func @_multi_dropout_kernel(%arg0: i32, %arg1: i32, %arg2: i32, %arg3: memref<1xi32, #tpu.memory_space<smem>>, %arg4: memref<8x128xbf16, #tpu.memory_space<vmem>>, %arg5: memref<128x128xbf16, #tpu.memory_space<vmem>>, %arg6: memref<1x128xf32, #tpu.memory_space<vmem>>, %arg7: memref<8x128xf32, #tpu.memory_space<vmem>>) attributes {dimension_semantics = [#tpu.dimension_semantics<parallel>, #tpu.dimension_semantics<parallel>, #tpu.dimension_semantics<arbitrary>], iteration_bounds = array<i64: 1, 1, 1>, scalar_prefetch = 1 : i64, scratch_operands = 0 : i64, tpu.core_type = #tpu.core_type<tc>, window_params = [{transform_indices = @transform_0, window_bounds = array<i64: 8, 128>}, {transform_indices = @transform_1, window_bounds = array<i64: 128, 128>}, {transform_indices = @transform_2, window_bounds = array<i64: 1, 128>}, {transform_indices = @transform_3, window_bounds = array<i64: 8, 128>}]} {
    %c0 = arith.constant 0 : index
    %c0_0 = arith.constant 0 : index
    %0 = vector.load %arg4[%c0, %c0_0] : memref<8x128xbf16, #tpu.memory_space<vmem>>, vector<8x128xbf16>
    %1 = arith.extf %0 : vector<8x128xbf16> to vector<8x128xf32>
    %2 = tpu.iota {dimensions = array<i32: 0>} : vector<8x128xi32>
    %c8_i32 = arith.constant 8 : i32
    %3 = arith.muli %arg0, %c8_i32 : i32
    %4 = vector.broadcast %3 : i32 to vector<8x128xi32>
    %5 = arith.addi %2, %4 : vector<8x128xi32>
    %6 = tpu.iota {dimensions = array<i32: 1>} : vector<8x128xi32>
    %c128_i32 = arith.constant 128 : i32
    %7 = arith.muli %arg2, %c128_i32 : i32
    %8 = vector.broadcast %7 : i32 to vector<8x128xi32>
    %9 = arith.addi %6, %8 : vector<8x128xi32>
    %c32_i32 = arith.constant 32 : i32
    %10 = vector.broadcast %c32_i32 : i32 to vector<8x128xi32>
    %11 = arith.muli %5, %10 : vector<8x128xi32>
    %12 = arith.addi %11, %9 : vector<8x128xi32>
    %c0_1 = arith.constant 0 : index
    %13 = memref.load %arg3[%c0_1] : memref<1xi32, #tpu.memory_space<smem>>
    %14 = vector.broadcast %13 : i32 to vector<8x128xi32>
    %15 = arith.addi %12, %14 : vector<8x128xi32>
    %c16_i32 = arith.constant 16 : i32
    %16 = vector.broadcast %c16_i32 : i32 to vector<8x128xi32>
    %17 = arith.shrui %15, %16 : vector<8x128xi32>
    %18 = arith.xori %15, %17 : vector<8x128xi32>
    %c2146121005_i32 = arith.constant 2146121005 : i32
    %19 = vector.broadcast %c2146121005_i32 : i32 to vector<8x128xi32>
    %20 = arith.muli %18, %19 : vector<8x128xi32>
    %c15_i32 = arith.constant 15 : i32
    %21 = vector.broadcast %c15_i32 : i32 to vector<8x128xi32>
    %22 = arith.shrui %20, %21 : vector<8x128xi32>
    %23 = arith.xori %20, %22 : vector<8x128xi32>
    %c-2073254261_i32 = arith.constant -2073254261 : i32
    %24 = vector.broadcast %c-2073254261_i32 : i32 to vector<8x128xi32>
    %25 = arith.muli %23, %24 : vector<8x128xi32>
    %c16_i32_2 = arith.constant 16 : i32
    %26 = vector.broadcast %c16_i32_2 : i32 to vector<8x128xi32>
    %27 = arith.shrui %25, %26 : vector<8x128xi32>
    %28 = arith.xori %25, %27 : vector<8x128xi32>
    %c0_i32 = arith.constant 0 : i32
    %29 = vector.broadcast %c0_i32 : i32 to vector<8x128xi32>
    %c42950_i32 = arith.constant 42950 : i32
    %30 = vector.broadcast %c42950_i32 : i32 to vector<8x128xi32>
    %31 = arith.cmpi uge, %28, %30 : vector<8x128xi32>
    %32 = arith.extui %31 : vector<8x128xi1> to vector<8x128xi32>
    %33 = arith.addi %29, %32 : vector<8x128xi32>
    %c1975685_i32 = arith.constant 1975685 : i32
    %34 = vector.broadcast %c1975685_i32 : i32 to vector<8x128xi32>
    %35 = arith.cmpi uge, %28, %34 : vector<8x128xi32>
    %36 = arith.extui %35 : vector<8x128xi1> to vector<8x128xi32>
    %37 = arith.addi %33, %36 : vector<8x128xi32>
    %c36764920_i32 = arith.constant 36764920 : i32
    %38 = vector.broadcast %c36764920_i32 : i32 to vector<8x128xi32>
    %39 = arith.cmpi uge, %28, %38 : vector<8x128xi32>
    %40 = arith.extui %39 : vector<8x128xi1> to vector<8x128xi32>
    %41 = arith.addi %37, %40 : vector<8x128xi32>
    %c349868036_i32 = arith.constant 349868036 : i32
    %42 = vector.broadcast %c349868036_i32 : i32 to vector<8x128xi32>
    %43 = arith.cmpi uge, %28, %42 : vector<8x128xi32>
    %44 = arith.extui %43 : vector<8x128xi1> to vector<8x128xi32>
    %45 = arith.addi %41, %44 : vector<8x128xi32>
    %c1758832057_i32 = arith.constant 1758832057 : i32
    %46 = vector.broadcast %c1758832057_i32 : i32 to vector<8x128xi32>
    %47 = arith.cmpi uge, %28, %46 : vector<8x128xi32>
    %48 = arith.extui %47 : vector<8x128xi1> to vector<8x128xi32>
    %49 = arith.addi %45, %48 : vector<8x128xi32>
    %50 = arith.sitofp %49 : vector<8x128xi32> to vector<8x128xf32>
    %cst = arith.constant 0.222222224 : f32
    %51 = vector.broadcast %cst : f32 to vector<8x128xf32>
    %52 = arith.mulf %50, %51 : vector<8x128xf32>
    %53 = arith.mulf %1, %52 : vector<8x128xf32>
    %54 = arith.truncf %53 : vector<8x128xf32> to vector<8x128xbf16>
    %c0_3 = arith.constant 0 : index
    %c0_4 = arith.constant 0 : index
    %55 = vector.load %arg5[%c0_3, %c0_4] : memref<128x128xbf16, #tpu.memory_space<vmem>>, vector<128x128xbf16>
    %cst_5 = arith.constant dense<0.000000e+00> : vector<8x128xf32>
    %56 = tpu.matmul %54, %55, %cst_5 {dimension_numbers = #tpu.dot_dimension_numbers<[1], [0], [0], [1], [0, 0, 1, 1], [], []>} : vector<8x128xbf16>, vector<128x128xbf16>, vector<8x128xf32> -> vector<8x128xf32>
    %c0_6 = arith.constant 0 : index
    %c0_7 = arith.constant 0 : index
    %57 = vector.load %arg6[%c0_6, %c0_7] : memref<1x128xf32, #tpu.memory_space<vmem>>, vector<1x128xf32>
    %58 = vector.broadcast %57 : vector<1x128xf32> to vector<8x128xf32>
    %59 = arith.addf %56, %58 : vector<8x128xf32>
    %c0_8 = arith.constant 0 : index
    %c0_9 = arith.constant 0 : index
    %60 = vector.load %arg7[%c0_8, %c0_9] : memref<8x128xf32, #tpu.memory_space<vmem>>, vector<8x128xf32>
    tpu.vector_store %arg7[%c0_8, %c0_9], %59 {strides = array<i32>} : memref<8x128xf32, #tpu.memory_space<vmem>>, vector<8x128xf32>,
    return
  }
  func.func @transform_0(%arg0: i32, %arg1: i32, %arg2: i32, %arg3: memref<1xi32, #tpu.memory_space<smem>>) -> (i32, i32) {
    %c0_i32 = arith.constant 0 : i32
    return %arg0, %arg2 : i32, i32
  }
  func.func @transform_1(%arg0: i32, %arg1: i32, %arg2: i32, %arg3: memref<1xi32, #tpu.memory_space<smem>>) -> (i32, i32) {
    %c0_i32 = arith.constant 0 : i32
    return %arg2, %arg1 : i32, i32
  }
  func.func @transform_2(%arg0: i32, %arg1: i32, %arg2: i32, %arg3: memref<1xi32, #tpu.memory_space<smem>>) -> (i32, i32) {
    %c0_i32 = arith.constant 0 : i32
    %c0_i32_0 = arith.constant 0 : i32
    return %c0_i32, %arg1 : i32, i32
  }
  func.func @transform_3(%arg0: i32, %arg1: i32, %arg2: i32, %arg3: memref<1xi32, #tpu.memory_space<smem>>) -> (i32, i32) {
    %c0_i32 = arith.constant 0 : i32
    return %arg0, %arg1 : i32, i32
  }
}

</mosaic_0001>

<bundles_post_ra>
// kernel: tpu_custom_call.1
= control target key start
LH: loop header
LB: loop body
LE: loop exit
PB: predicated region body
PF: predicated region fallthrough
CT: control target
= control target key end

     0   :  { %10 = vsyncpa [#allocation5], 0  ;;  %s376_s0 = inlined_call_operand.<no memory space> [shape: s32[1], index: 0, kind: input, shape index: {}]   ;;  %s377_s1 = inlined_call_operand.hbm [shape: bf16[8,128], index: 1, kind: input, shape index: {}]   ;;  %s378_s2 = inlined_call_operand.hbm [shape: bf16[128,128], index: 2, kind: input, shape index: {}]   ;;  %s379_s3 = inlined_call_operand.vmem [shape: f32[1,128], index: 3, kind: input, shape index: {}]   ;;  %s380_s4 = inlined_call_operand.hbm [shape: f32[8,128], index: 4, kind: output, shape index: {}]  }
   0x1   :  { %11 = vsyncpa [#allocation8], 0 }
   0x2   :  { %12 = vsyncpa [#allocation6], 0  ;;  %s18_s17 = sshll.u32 %s377_s1, 4  ;;  %s330_s18 = smov [#allocation4]   ;;  %s19_s17 = int_to_ptr.hbm [resolvable:$true] %s18_s17 }
   0x3   :  { %s20_s19 = sshll.u32 %s330_s18, 4  ;;  %s28_s22 = sshll.u32 %s378_s2, 4  ;;  %s21_s19 = int_to_ptr.vmem [resolvable:$true] %s20_s19  ;;  %s29_s22 = int_to_ptr.hbm [resolvable:$true] %s28_s22 }
   0x4   :  { %23 = dma.hbm_to_vmem [thread:$0]  %s19_s17, 64, %s21_s19, [#allocation5]  }
   0x5   :  { %s331_s23 = smov [#allocation7]   ;;  %s332_s25 = smov 64  }
   0x6   :  { %s30_s24 = sshll.u32 %s331_s23, 4  ;;  %s333_s26 = smov 4   ;;  %s31_s24 = int_to_ptr.vmem [resolvable:$true] %s30_s24 }
   0x7   :  { %36 = dma.hbm_to_vmem [thread:$0]  %s29_s22, 1024, %s31_s24, [#allocation8], %s332_s25, %s332_s25, %s333_s26  }
   0x8   :  { %324 = dma.done.wait [#allocation5], 64  }
   0x9   :  { %325 = vsyncadd [#allocation5], 4294967232 }
   0xa   :  { %326 = dma.done.wait [#allocation8], 1024  }
   0xb   :  { %327 = vsyncadd [#allocation8], 4294966272  ;;  %v49_v0 = vlaneseq  ;;  %v62_v4 = vstv %s376_s0  ;;  %v244_v6 = vld [vmem:[#allocation7 + $0x38] sm:$0xff]  ;;  %v243_v8 = vld [vmem:[#allocation7 + $0x30] sm:$0xff]  ;;  %v334_v23 = vmov 0   ;;  %s335_s28 = smov [#allocation9]  }
   0xc   :  { %168 = vmatpush.bf16.msra.mxu0 %v244_v6  ;;  %v242_v11 = vld [vmem:[#allocation7 + $0x28] sm:$0xff]  ;;  %v241_v14 = vld [vmem:[#allocation7 + $0x20] sm:$0xff]  ;;  %v240_v17 = vld [vmem:[#allocation7 + $0x18] sm:$0xff]  ;;  %s187_s29 = sshll.u32 %s335_s28, 4  ;;  %s189_s6 = sshll.u32 %s380_s4, 4  ;;  %s188_s29 = int_to_ptr.vmem [resolvable:$true] %s187_s29  ;;  %s190_s6 = int_to_ptr.hbm [resolvable:$true] %s189_s6 }
   0xd   :  { %v50_v1 = vshrl.u32 %v49_v0, 7  ;;  %v55_v2 = vand.u32 127, %v49_v0  ;;  %v239_v20 = vld [vmem:[#allocation7 + $0x10] sm:$0xff]  ;;  %v238_v22 = vld [vmem:[#allocation7 + $0x8] sm:$0xff]  ;;  %v237_v30 = vld [vmem:[#allocation7] sm:$0xff] }
   0xe   :  { %v47_v33 = vld [vmem:[#allocation4] sm:$0xf] }
   0xf   :  { %v59_v3 = vmul.u32 32, %v50_v1  ;;  %v48_v35 = vunpack.c.l.bf16 %v47_v33  ;;  %v251_v40 = vld [vmem:[%s379_s3] ss:$0 sm:$0xff] }
  0x10   :  { %169 = vmatpush.bf16.msra.mxu0 %v243_v8 }
  0x11   :  { %v60_v5 = vadd.s32 %v59_v3, %v55_v2 }
  0x13   :  { %v63_v7 = vadd.s32 %v62_v4, %v60_v5 }
  0x14   :  { %170 = vmatpush.bf16.msra.mxu0 %v242_v11 }
  0x15   :  { %v64_v9 = vshrl.u32 %v63_v7, 16 }
  0x17   :  { %v65_v10 = vxor.u32 %v64_v9, %v63_v7 }
  0x18   :  { %171 = vmatpush.bf16.msra.mxu0 %v241_v14 }
  0x19   :  { %v66_v12 = vmul.u32 2146121005, %v65_v10 }
  0x1b   :  { %v67_v13 = vshrl.u32 %v66_v12, 15 }
  0x1c   :  { %172 = vmatpush.bf16.msra.mxu0 %v240_v17 }
  0x1d   :  { %v68_v15 = vxor.u32 %v67_v13, %v66_v12 }
  0x1f   :  { %v69_v16 = vmul.u32 2221713035, %v68_v15 }
  0x20   :  { %173 = vmatpush.bf16.msra.mxu0 %v239_v20 }
  0x21   :  { %v70_v18 = vshrl.u32 %v69_v16, 16 }
  0x23   :  { %v71_v19 = vxor.u32 %v70_v18, %v69_v16 }
  0x24   :  { %174 = vmatpush.bf16.msra.mxu0 %v238_v22 }
  0x25   :  { %v200_v21 = vxor.u32 2147483648, %v71_v19 }
  0x27   :  { %vm74_vm0 = vcmp.ge.s32.totalorder %v200_v21, 2147526598  ;;  %vm78_vm1 = vcmp.ge.s32.totalorder %v200_v21, 2149459333  ;;  %vm83_vm2 = vcmp.ge.s32.totalorder %v200_v21, 2184248568 }
  0x28   :  { %v75_v24 = vsel %vm74_vm0, 1, %v334_v23  ;;  %v79_v25 = vsel %vm78_vm1, 1, %v334_v23  ;;  %v84_v26 = vsel %vm83_vm2, 1, %v334_v23  ;;  %vm88_vm3 = vcmp.ge.s32.totalorder %v200_v21, 2497351684  ;;  %175 = vmatpush.bf16.msra.mxu0 %v237_v30 }
  0x29   :  { %v80_v27 = vadd.s32 %v79_v25, %v75_v24  ;;  %vm93_vm4 = vcmp.ge.s32.totalorder %v200_v21, 3906315705  ;;  %v89_v28 = vsel %vm88_vm3, 1, %v334_v23 }
  0x2a   :  { %v94_v31 = vsel %vm93_vm4, 1, %v334_v23 }
  0x2b   :  { %v85_v29 = vadd.s32 %v84_v26, %v80_v27 }
  0x2d   :  { %v90_v32 = vadd.s32 %v89_v28, %v85_v29 }
  0x2f   :  { %v95_v34 = vadd.s32 %v94_v31, %v90_v32 }
  0x31   :  { %v96_v36 = vcvt.s32.f32 %v95_v34 }
  0x33   :  { %v97_v37 = vmul.f32 0.22222222, %v96_v36 }
  0x35   :  { %v98_v38 = vmul.f32 %v97_v37, %v48_v35 }
  0x37   :  { %v99_v39 = vpack.c.bf16 %v98_v38, %v98_v38 }
  0x39   :  { %176 = vmatmul.bf16.vlgmr.msra.gmra.mxu0 %v99_v39 }
  0xb6   :  { %v177_v41 = vpop.f32.mrf.mxu0 }
  0xb7   :  { %v178_v42 = vadd.f32 %v251_v40, %v177_v41 }
  0xb9   :  { %181 = vst [vmem:[#allocation9] sm:$0xff] %v178_v42 }
  0xba   :  { %192 = dma.vmem_to_hbm [thread:$0]  %s188_s29, 128, %s190_s6, [#allocation6]  }
  0xbe   :  { %v179_v43 = vpop.f32.mrf.mxu0 }
  0xbf   :  { %328 = dma.done.wait [#allocation6], 128  }
  0xc0   :  { %329 = vsyncadd [#allocation6], 4294967168 }
  0xc1   :  { %197 = vsyncpa [#allocation5], 1 }
  0xc2   :  { %198 = vsyncpa [#allocation8], 1 }
  0xc3   :  { %199 = vsyncpa [#allocation6], 1 }

</bundles_post_ra>
